<compile_context>
chip_gen: v7x
topology: tpu7x:2x2x1
jax: 0.10.0
libtpu: 0.0.40
codegen_flags: <defaults>
</compile_context>

<pallas_src>
import functools

import jax
import jax.numpy as jnp
from jax.experimental import pallas as pl
from jax.experimental.pallas import tpu as pltpu


# Generation-aware tuning: input-block target bytes, VMEM-limit ceiling, and
# whether to use the single-read-pass variance.
_GEN_CFG = {
    7: dict(target_bytes=6 << 20,  vmem_ceiling=48 << 20, one_pass=True),
    6: dict(target_bytes=12 << 20, vmem_ceiling=96 << 20, one_pass=False),
    5: dict(target_bytes=3 << 20,  vmem_ceiling=64 << 20, one_pass=False),
}
_DEFAULT_CFG = dict(target_bytes=4 << 20, vmem_ceiling=48 << 20, one_pass=False)


def _chip_generation():
    """Best-effort TPU generation from device_kind; None if unknown."""
    try:
        kind = jax.devices()[0].device_kind.lower()
    except Exception:
        return None
    for g in (7, 6, 5, 4):
        if f"v{g}" in kind:
            return g
    return None


def _specific_bn_kernel(x_ref, tb_ref, o_ref, *, eps, inv_l, one_pass,
                        apply_in_input_dtype):
    # x_ref:  (N, TC, HW)   input block (channels on sublanes, HW on lanes)
    # tb_ref: (TC, 2)       col 0 = fused per-channel scale theta, col 1 = bias
    x = x_ref[...]
    xf = x.astype(jnp.float32)

    if one_pass:
        # Single read pass over the block: var = E[x^2] - mean^2 (f32 accum).
        s = jnp.sum(xf, axis=(0, 2), keepdims=True)              # (1, TC, 1)
        sq = jnp.sum(xf * xf, axis=(0, 2), keepdims=True)        # (1, TC, 1)
        mean = s * inv_l
        var = jnp.maximum(sq * inv_l - mean * mean, 0.0)
    else:
        # Two-pass centered variance (numerically safer; free when DMA-bound).
        mean = jnp.sum(xf, axis=(0, 2), keepdims=True) * inv_l   # (1, TC, 1)
        d = xf - mean
        var = jnp.sum(d * d, axis=(0, 2), keepdims=True) * inv_l # (1, TC, 1)

    theta = tb_ref[:, 0:1][None]                                 # (1, TC, 1)
    bias = tb_ref[:, 1:2][None]                                  # (1, TC, 1)

    # Fused scale/shift: y = x * a + b  (2 VALU ops per element).
    a = theta * jax.lax.rsqrt(var + eps)                         # (1, TC, 1)
    b = bias - mean * a                                          # (1, TC, 1), f32

    if apply_in_input_dtype:
        # bf16 apply pass (v6e/v7x bf16 VALU): half the elementwise VALU work
        # and no full-block f32 temporary on the store path.
        o_ref[...] = (x * a.astype(x.dtype) + b.astype(x.dtype)).astype(o_ref.dtype)
    else:
        o_ref[...] = (xf * a + b).astype(o_ref.dtype)


def _pick_channel_block(C, N, HW, itemsize, *, target_bytes, min_steps):
    """Largest channel block that (a) divides C, (b) is a multiple of the dtype
    sublane tile, (c) keeps the input block under target_bytes, and (d) leaves
    at least `min_steps` grid steps so double-buffering / megacore engage."""
    per_c = max(N * HW * itemsize, 1)
    align = {4: 8, 2: 16, 1: 32}.get(itemsize, 8)

    # Trivially small input: one block, pipelining irrelevant.
    if C * per_c <= 256 * 1024:
        return C

    cands = [t for t in range(align, C + 1, align) if C % t == 0]
    if not cands:
        # TODO(synk): C has no multiple-of-`align` divisor (e.g. C=100); falls
        # back to a single full-C block instead of a masked partial block.
        return C

    fitting = [t for t in cands if t * per_c <= target_bytes] or [min(cands)]
    # TODO(synk): if even the smallest per-channel block exceeds VMEM (huge
    # N*H*W per channel), add a trailing "arbitrary" HW-reduction grid axis
    # with sum/sumsq scratch accumulators and a second normalize pass.

    step_cap = max(C // min_steps, align)
    capped = [t for t in fitting if t <= step_cap]
    return max(capped or fitting)


def specific_batch_norm(x_nchw, global_weight, global_weight_atten,
                        specific_weight, specific_bias, *, eps=1e-5):
    """x_nchw: (N, C, H, W); global_weight: (C, K); atten: (K,);
    specific_weight: (C, 1); specific_bias: (C,)."""
    N, C, H, W = x_nchw.shape
    HW = H * W
    L = N * HW

    gen = _chip_generation()
    cfg = _GEN_CFG.get(gen, _DEFAULT_CFG)

    # theta hoisted out of the kernel (tiny (C, K) op); theta and bias merged
    # into one (C, 2) f32 array -> a single small per-step param DMA.
    gw = global_weight.reshape(C, -1).astype(jnp.float32)
    atten = global_weight_atten.reshape(1, -1).astype(jnp.float32)
    theta = (jnp.sum(atten * gw, axis=-1, keepdims=True)
             + specific_weight.reshape(C, 1).astype(jnp.float32))        # (C, 1)
    bias = specific_bias.reshape(C, 1).astype(jnp.float32)               # (C, 1)
    theta_bias = jnp.concatenate([theta, bias], axis=1)                  # (C, 2)

    # Free, contiguous reshape — no HBM transpose traffic.
    # TODO(synk): if H*W is far from a multiple of 128 (e.g. 7x7 maps) and this
    # BN is hot, repack channel-last outside the kernel for lane-dense stores.
    x3 = x_nchw.reshape(N, C, HW)

    itemsize = jnp.dtype(x3.dtype).itemsize
    min_steps = 8 if gen == 7 else 4  # even step count keeps both v7x TCs busy
    tc = _pick_channel_block(C, N, HW, itemsize,
                             target_bytes=cfg["target_bytes"],
                             min_steps=min_steps)
    grid = (C // tc,)

    # VMEM budget: double-buffered input + output blocks plus ~2 f32 temporaries.
    block_bytes = N * tc * HW * itemsize
    f32_block = N * tc * HW * 4
    needed = 4 * block_bytes + 2 * f32_block + (2 << 20)
    vmem_limit = int(min(cfg["vmem_ceiling"], max(needed, 32 << 20)))

    apply_in_input_dtype = (jnp.dtype(x3.dtype) == jnp.dtype(jnp.bfloat16)
                            and gen in (6, 7))

    kernel = functools.partial(
        _specific_bn_kernel, eps=float(eps), inv_l=1.0 / L,
        one_pass=cfg["one_pass"], apply_in_input_dtype=apply_in_input_dtype)

    out3 = pl.pallas_call(
        kernel,
        out_shape=jax.ShapeDtypeStruct((N, C, HW), x3.dtype),
        grid_spec=pltpu.PrefetchScalarGridSpec(
            num_scalar_prefetch=0,
            grid=grid,
            in_specs=[
                pl.BlockSpec((N, tc, HW), lambda c: (0, c, 0)),
                pl.BlockSpec((tc, 2), lambda c: (c, 0)),
            ],
            out_specs=pl.BlockSpec((N, tc, HW), lambda c: (0, c, 0)),
        ),
        compiler_params=pltpu.CompilerParams(
            dimension_semantics=("parallel",),
            vmem_limit_bytes=vmem_limit),
    )(x3, theta_bias)

    return out3.reshape(N, C, H, W)


if __name__ == "__main__":
    key = jax.random.PRNGKey(0)
    k_x, k_gw, k_sw, k_b = jax.random.split(key, 4)

    N, C, H, W = 2, 4, 16, 16
    eps = 1e-5
    atten_default = 0.8

    x = jax.random.normal(k_x, (N, C, H, W), dtype=jnp.float32)

    # Parameter init mirroring SpecificLayer.init_training_weights:
    # global_weight is the (C,) BN gamma reshaped to (C, 1); atten = 0.8 * ones(1);
    # Specific_weight = (1 - atten) * global_weight; Specific_bias is per-channel.
    global_weight = jax.random.normal(k_gw, (C, 1), dtype=jnp.float32)
    global_weight_atten = jnp.ones((1,), dtype=jnp.float32) * atten_default
    specific_weight = (1.0 - global_weight_atten) * global_weight         # (C, 1)
    specific_bias = jax.random.normal(k_b, (C,), dtype=jnp.float32)

    out = specific_batch_norm(x, global_weight, global_weight_atten,
                              specific_weight, specific_bias, eps=eps)
    out = jax.block_until_ready(out)

    # Pure-JAX reference check (training-mode BN with batch statistics).
    theta_ref = (jnp.sum(global_weight_atten * global_weight, axis=-1)
                 + specific_weight[:, 0])                                 # (C,)
    mean = jnp.mean(x, axis=(0, 2, 3))
    var = jnp.var(x, axis=(0, 2, 3))
    ref = ((x - mean[None, :, None, None])
           / jnp.sqrt(var[None, :, None, None] + eps)
           * theta_ref[None, :, None, None]
           + specific_bias[None, :, None, None])

    assert out.shape == (N, C, H, W)
    assert jnp.max(jnp.abs(out - ref)) < 1e-4, "mismatch vs reference"
    print("KERNEL_OK")
</pallas_src>

<mosaic_0001>
module attributes {stable_mosaic.version = 11 : i64} {
  func.func @_specific_bn_kernel(%arg0: i32, %arg1: memref<2x4x256xf32, #tpu.memory_space<vmem>>, %arg2: memref<4x2xf32, #tpu.memory_space<vmem>>, %arg3: memref<2x4x256xf32, #tpu.memory_space<vmem>>) attributes {dimension_semantics = [#tpu.dimension_semantics<parallel>], iteration_bounds = array<i64: 1>, scalar_prefetch = 0 : i64, scratch_operands = 0 : i64, tpu.core_type = #tpu.core_type<tc>, window_params = [{transform_indices = @transform_0, window_bounds = array<i64: 2, 4, 256>}, {transform_indices = @transform_1, window_bounds = array<i64: 4, 2>}, {transform_indices = @transform_2, window_bounds = array<i64: 2, 4, 256>}]} {
    %c0 = arith.constant 0 : index
    %c0_0 = arith.constant 0 : index
    %c0_1 = arith.constant 0 : index
    %0 = vector.load %arg1[%c0, %c0_0, %c0_1] : memref<2x4x256xf32, #tpu.memory_space<vmem>>, vector<2x4x256xf32>
    %cst = arith.constant dense<0.000000e+00> : vector<4xf32>
    %1 = vector.multi_reduction <add>, %0, %cst [0, 2] : vector<2x4x256xf32> to vector<4xf32>
    %2 = vector.shape_cast %1 : vector<4xf32> to vector<1x4x1xf32>
    %cst_2 = arith.constant 0.001953125 : f32
    %3 = vector.broadcast %cst_2 : f32 to vector<1x4x1xf32>
    %4 = arith.mulf %2, %3 : vector<1x4x1xf32>
    %5 = vector.broadcast %4 : vector<1x4x1xf32> to vector<2x4x256xf32>
    %6 = arith.subf %0, %5 : vector<2x4x256xf32>
    %7 = arith.mulf %6, %6 : vector<2x4x256xf32>
    %cst_3 = arith.constant dense<0.000000e+00> : vector<4xf32>
    %8 = vector.multi_reduction <add>, %7, %cst_3 [0, 2] : vector<2x4x256xf32> to vector<4xf32>
    %9 = vector.shape_cast %8 : vector<4xf32> to vector<1x4x1xf32>
    %cst_4 = arith.constant 0.001953125 : f32
    %10 = vector.broadcast %cst_4 : f32 to vector<1x4x1xf32>
    %11 = arith.mulf %9, %10 : vector<1x4x1xf32>
    %c0_5 = arith.constant 0 : index
    %c0_6 = arith.constant 0 : index
    %12 = vector.load %arg2[%c0_5, %c0_6] : memref<4x2xf32, #tpu.memory_space<vmem>>, vector<4x1xf32>
    %13 = vector.shape_cast %12 : vector<4x1xf32> to vector<1x4x1xf32>
    %c0_7 = arith.constant 0 : index
    %c1 = arith.constant 1 : index
    %14 = vector.load %arg2[%c0_7, %c1] : memref<4x2xf32, #tpu.memory_space<vmem>>, vector<4x1xf32>
    %15 = vector.shape_cast %14 : vector<4x1xf32> to vector<1x4x1xf32>
    %cst_8 = arith.constant 9.99999974E-6 : f32
    %16 = vector.broadcast %cst_8 : f32 to vector<1x4x1xf32>
    %17 = arith.addf %11, %16 : vector<1x4x1xf32>
    %18 = math.rsqrt %17 : vector<1x4x1xf32>
    %19 = arith.mulf %13, %18 : vector<1x4x1xf32>
    %20 = arith.mulf %4, %19 : vector<1x4x1xf32>
    %21 = arith.subf %15, %20 : vector<1x4x1xf32>
    %22 = vector.broadcast %19 : vector<1x4x1xf32> to vector<2x4x256xf32>
    %23 = arith.mulf %0, %22 : vector<2x4x256xf32>
    %24 = vector.broadcast %21 : vector<1x4x1xf32> to vector<2x4x256xf32>
    %25 = arith.addf %23, %24 : vector<2x4x256xf32>
    %c0_9 = arith.constant 0 : index
    %c0_10 = arith.constant 0 : index
    %c0_11 = arith.constant 0 : index
    %26 = vector.load %arg3[%c0_9, %c0_10, %c0_11] : memref<2x4x256xf32, #tpu.memory_space<vmem>>, vector<2x4x256xf32>
    tpu.vector_store %arg3[%c0_9, %c0_10, %c0_11], %25 {strides = array<i32>} : memref<2x4x256xf32, #tpu.memory_space<vmem>>, vector<2x4x256xf32>,
    return
  }
  func.func @transform_0(%arg0: i32) -> (i32, i32, i32) {
    %c0_i32 = arith.constant 0 : i32
    %c0_i32_0 = arith.constant 0 : i32
    %c0_i32_1 = arith.constant 0 : i32
    return %c0_i32, %arg0, %c0_i32_0 : i32, i32, i32
  }
  func.func @transform_1(%arg0: i32) -> (i32, i32) {
    %c0_i32 = arith.constant 0 : i32
    %c0_i32_0 = arith.constant 0 : i32
    return %arg0, %c0_i32 : i32, i32
  }
  func.func @transform_2(%arg0: i32) -> (i32, i32, i32) {
    %c0_i32 = arith.constant 0 : i32
    %c0_i32_0 = arith.constant 0 : i32
    %c0_i32_1 = arith.constant 0 : i32
    return %c0_i32, %arg0, %c0_i32_0 : i32, i32, i32
  }
}

</mosaic_0001>

<bundles_post_ra>
// kernel: tpu_custom_call.1
= control target key start
LH: loop header
LB: loop body
LE: loop exit
PB: predicated region body
PF: predicated region fallthrough
CT: control target
= control target key end

     0   :  { %7 = vsyncpa [#allocation3], 0  ;;  %s257_s0 = inlined_call_operand.hbm [shape: f32[2,4,256], index: 0, kind: input, shape index: {}]   ;;  %s258_s1 = inlined_call_operand.vmem [shape: f32[4,2], index: 1, kind: input, shape index: {}]   ;;  %s259_s2 = inlined_call_operand.hbm [shape: f32[2,4,256], index: 2, kind: output, shape index: {}]  }
   0x1   :  { %8 = vsyncpa [#allocation4], 0  ;;  %s193_s9 = smov [#allocation2]   ;;  %s145_s13 = scalar_lea.hbm %s257_s0, 256 }
   0x2   :  { %s14_s10 = sshll.u32 %s193_s9, 4  ;;  %p146_p0 = scmp.ne.s32.totalorder %s257_s0, %s145_s13  ;;  %s15_s10 = int_to_ptr.vmem [resolvable:$true] %s14_s10 }
   0x3   :  { %p149_p1 = scmp.lt.u32.totalorder %s145_s13, %s257_s0 }
   0x5   :  { %p151_p2 = pnand %p149_p1, %p146_p0 }
   0x7   :  { %154 = shalt.err (!%p151_p2)
}
   0x8   :  { %s155_s18 = scalar_lea.vmem %s15_s10, 256  ;;  %p160_p4 = scmp.lt.s32.totalorder %s15_s10, %s15_s10 }
   0x9   :  { %p156_p3 = scmp.ne.s32.totalorder %s15_s10, %s155_s18  ;;  %p161_p5 = scmp.lt.s32.totalorder %s155_s18, %s155_s18 }
   0xb   :  { %p162_p6 = por %p161_p5, %p160_p4 }
   0xd   :  { %p163_p7 = pnand %p162_p6, %p156_p3 }
   0xf   :  { %166 = shalt.err (!%p163_p7)
}
  0x10   :  { %s194_s19 = smov 128   ;;  %s195_s20 = smov 8  }
  0x11   :  { %20 = dma.hbm_to_vmem [thread:$0]  %s257_s0, 256, %s15_s10, [#allocation3], %s194_s19, %s194_s19, %s195_s20  }
  0x12   :  { %189 = dma.done.wait [#allocation3], 256  }
  0x13   :  { %190 = vsyncadd [#allocation3], 4294967040  ;;  %vm34_vm0 = vcmask 1043456   ;;  %v26_v0 = vld [vmem:[#allocation2] sm:$0xff]  ;;  %v27_v1 = vld [vmem:[#allocation2 + $0x8] sm:$0xff]  ;;  %v49_v13 = vlaneseq  ;;  %v197_v33 = vmov 0  }
  0x14   :  { %v30_v2 = vcombine.high %v26_v0, %v26_v0  ;;  %v31_v3 = vcombine.high %v27_v1, %v27_v1  ;;  %v35_v4 = vsel %vm34_vm0, %v26_v0, 0.0  ;;  %v38_v6 = vsel %vm34_vm0, %v27_v1, 0.0  ;;  %139 = vset.pattern.permute.xlu1 %v197_v33  ;;  %v74_v38 = vld [vmem:[%s258_s1] sm:$0xf]  ;;  %s199_s24 = smov 1   ;;  %s200_s25 = smov [#allocation5]  }
  0x15   :  { %v196_v11 = vmov 839922192   ;;  %v50_v15 = vshrl.u32 %v49_v13, 7  ;;  %v198_v37 = vmov 1   ;;  %s119_s26 = sshll.u32 %s200_s25, 4  ;;  %s120_s26 = int_to_ptr.vmem [resolvable:$true] %s119_s26 }
  0x16   :  { %v36_v5 = vsel %vm34_vm0, %v30_v2, 0.0  ;;  %v40_v8 = vsel %vm34_vm0, %v31_v3, 0.0  ;;  %v47_v12 = vunpack.c.l.s4 %v196_v11  ;;  %140 = vset.pattern.permute.xlu0 %v198_v37  ;;  %s167_s1 = scalar_lea.vmem %s120_s26, 256  ;;  %p172_p9 = scmp.lt.s32.totalorder %s120_s26, %s120_s26 }
  0x17   :  { %v37_v7 = vadd.f32 %v36_v5, %v35_v4  ;;  %p168_p8 = scmp.ne.s32.totalorder %s120_s26, %s167_s1  ;;  %p173_p10 = scmp.lt.s32.totalorder %s167_s1, %s167_s1 }
  0x18   :  { %v48_v14 = vunpack.c.0.s8 %v47_v12 }
  0x19   :  { %v39_v9 = vadd.f32 %v38_v6, %v37_v7  ;;  %p174_p11 = por %p173_p10, %p172_p9 }
  0x1a   :  { %v51_v16 = vsub.s32 %v48_v14, %v50_v15 }
  0x1b   :  { %v41_v10 = vadd.f32 %v40_v8, %v39_v9  ;;  %p175_p12 = pnand %p174_p11, %p168_p8 }
  0x1d   :  { %42 = vadd.xlane.f32.xlu0 %v41_v10 }
  0xaa   :  { %v43_v17 = vpop.xlane.xlu0 %42 }
  0xab   :  { %v44_v18 = vmul.f32 0.001953125, %v43_v17 }
  0xad   :  { %v52_v19 = vrot.slane %v44_v18, %v51_v16 }
  0xaf   :  { %v54_v20 = vsub.f32 %v26_v0, %v52_v19  ;;  %v55_v21 = vsub.f32 %v27_v1, %v52_v19 }
  0xb1   :  { %v56_v22 = vmul.f32 %v54_v20, %v54_v20  ;;  %v57_v23 = vmul.f32 %v55_v21, %v55_v21 }
  0xb3   :  { %v60_v24 = vcombine.high %v56_v22, %v56_v22  ;;  %v61_v25 = vcombine.high %v57_v23, %v57_v23  ;;  %v64_v26 = vsel %vm34_vm0, %v56_v22, 0.0  ;;  %v67_v29 = vsel %vm34_vm0, %v57_v23, 0.0 }
  0xb5   :  { %v65_v27 = vsel %vm34_vm0, %v60_v24, 0.0  ;;  %v69_v31 = vsel %vm34_vm0, %v61_v25, 0.0 }
  0xb6   :  { %v66_v28 = vadd.f32 %v65_v27, %v64_v26 }
  0xb8   :  { %v68_v30 = vadd.f32 %v67_v29, %v66_v28 }
  0xba   :  { %v70_v32 = vadd.f32 %v69_v31, %v68_v30 }
  0xbc   :  { %71 = vadd.xlane.f32.xlu0 %v70_v32 }
 0x149   :  { %v72_v34 = vpop.xlane.xlu0 %71 }
 0x14a   :  { %v73_v35 = vmul.f32 0.001953125, %v72_v34 }
 0x14c   :  { %v75_v36 = vadd.f32 1e-05, %v73_v35 }
 0x14e   :  { %143 = vrsqrt.f32 %v75_v36 }
 0x158   :  { %v144_v39 = vpop.eup %143 }
 0x159   :  { %v77_v40 = vmul.f32 %v144_v39, %v74_v38 }
 0x15b   :  { %v78_v41 = vmul.f32 %v77_v40, %v44_v18 }
 0x15d   :  { %80 = vrot.lane.b32.xlu1 %v78_v41, %s199_s24 }
 0x161   :  { %86 = vperm.xlu1 %139, %v77_v40  }
 0x1cf   :  { %v81_v42 = vpop.permute.xlu1 %80 }
 0x1d0   :  { %v83_v43 = vsub.f32 %v74_v38, %v81_v42 }
 0x1d2   :  { %100 = vperm.xlu0 %140, %v83_v43  }
 0x1e0   :  { %v87_v44 = vpop.permute.xlu1 %86 }
 0x1e1   :  { %v94_v45 = vrot.slane %v87_v44, %v51_v16 }
 0x1e3   :  { %v96_v47 = vmul.f32 %v94_v45, %v26_v0  ;;  %v97_v48 = vmul.f32 %v94_v45, %v27_v1 }
 0x251   :  { %v101_v46 = vpop.permute.xlu0 %100 }
 0x252   :  { %v108_v49 = vrot.slane %v101_v46, %v51_v16 }
 0x254   :  { %v110_v50 = vadd.f32 %v108_v49, %v96_v47  ;;  %v111_v51 = vadd.f32 %v108_v49, %v97_v48 }
 0x256   :  { %112 = vst [vmem:[#allocation5] sm:$0xff] %v110_v50  ;;  %113 = vst [vmem:[#allocation5 + $0x8] sm:$0xff] %v111_v51 }
 0x257   :  { %178 = shalt.err (!%p175_p12)
}
 0x258   :  { %s179_s29 = scalar_lea.hbm %s259_s2, 256 }
 0x259   :  { %p180_p13 = scmp.ne.s32.totalorder %s259_s2, %s179_s29  ;;  %p183_p0 = scmp.lt.u32.totalorder %s179_s29, %s259_s2 }
 0x25b   :  { %p185_p1 = pnand %p183_p0, %p180_p13 }
 0x25d   :  { %188 = shalt.err (!%p185_p1)
}
 0x25e   :  { %125 = dma.vmem_to_hbm [thread:$0]  %s120_s26, 256, %s259_s2, [#allocation4], %s194_s19, %s194_s19, %s195_s20  }
 0x25f   :  { %191 = dma.done.wait [#allocation4], 256  }
 0x260   :  { %192 = vsyncadd [#allocation4], 4294967040 }
 0x261   :  { %129 = vsyncpa [#allocation3], 1 }
 0x262   :  { %130 = vsyncpa [#allocation4], 1 }

</bundles_post_ra>
